<compile_context>
chip_gen: v7x
topology: tpu7x:2x2x1
jax: 0.10.0
libtpu: 0.0.40
codegen_flags: <defaults>
</compile_context>

<pallas_src>
import jax
import jax.numpy as jnp
from jax.experimental import pallas as pl
from jax.experimental.pallas import tpu as pltpu

LN_EPS = 1e-5  # torch.nn.LayerNorm default


def _round_up(n, m):
    return ((n + m - 1) // m) * m


def _layer_norm(x, gamma, beta):
    # One-pass statistics: E[x] and E[x^2] are independent reductions, so they
    # pipeline across the XLU ports instead of the serial
    # reduce -> subtract -> reduce chain of the centered two-pass form.
    mu = jnp.mean(x, axis=-1, keepdims=True)
    ms = jnp.mean(x * x, axis=-1, keepdims=True)
    var = ms - mu * mu
    inv = jax.lax.rsqrt(var + LN_EPS)
    return (x - mu) * inv * gamma + beta


def _layer_norm_two_pass(x, gamma, beta):
    # Torch-exact centered form, used only by the f32 reference.
    mu = jnp.mean(x, axis=-1, keepdims=True)
    xc = x - mu
    var = jnp.mean(xc * xc, axis=-1, keepdims=True)
    return xc * jax.lax.rsqrt(var + LN_EPS) * gamma + beta


def lnlstm_kernel(x_ref, h_ref, c_ref, wx_ref, wh_ref, gamma_ref, beta_ref,
                  h_out_ref, c_out_ref):
    H = c_ref.shape[1]

    # Fused gate projection on the MXU: z = x @ Wx + h @ Wh.
    # x/h/Wx/Wh arrive as bf16 (half the DMA); accumulation is f32.
    z = jnp.dot(x_ref[...], wx_ref[...], preferred_element_type=jnp.float32)
    z = z + jnp.dot(h_ref[...], wh_ref[...], preferred_element_type=jnp.float32)
    # TODO(synk): if ever MXU-bound on v5e (large block_b), pad D_in to 128 and
    # fuse the two dots into one K=(D_in+H) matmul for better systolic fill.

    # Per-gate LayerNorm in torch's split order (f, i, o, u), then activations.
    # H == 128 keeps every gate slice lane-tile aligned (no masked stores).
    gates = [
        _layer_norm(z[:, k * H:(k + 1) * H], gamma_ref[k, :], beta_ref[k, :])
        for k in range(4)
    ]
    f = jax.nn.sigmoid(gates[0])
    i = jax.nn.sigmoid(gates[1])
    o = jax.nn.sigmoid(gates[2])
    u = jnp.tanh(gates[3])

    c_new = _layer_norm(i * u + f * c_ref[...].astype(jnp.float32),
                        gamma_ref[4, :], beta_ref[4, :])

    c_out_ref[...] = c_new.astype(c_out_ref.dtype)
    h_out_ref[...] = (o * jnp.tanh(c_new)).astype(h_out_ref.dtype)


def prepare_params(w_t, input_size, fiou_gamma, fiou_beta, cell_gamma, cell_beta):
    """One-time parameter prep (outside any recurrent loop).

    w_t: (D_in + H, 4H) f32  (= torch fiou_linear.weight.T)
    Returns bf16 Wx (D_in, 4H), bf16 Wh (H, 4H), packed gamma/beta (5, H) f32
    (rows 0-3 = f,i,o,u gate LN, row 4 = cell LN).
    """
    # TODO(synk): for weight-DMA-bound deployments, quantize Wx/Wh to int8
    # (v5e/v6e MXU int path) or fp8 e4m3 (v7x has no MXU int path) with
    # per-output-channel scales folded into gamma; kept bf16 here so the
    # kernel stays numerically close to the f32 torch module.
    wx = w_t[:input_size].astype(jnp.bfloat16)
    wh = w_t[input_size:].astype(jnp.bfloat16)
    gamma = jnp.concatenate([fiou_gamma, cell_gamma], axis=0)   # (5, H)
    beta = jnp.concatenate([fiou_beta, cell_beta], axis=0)      # (5, H)
    return wx, wh, gamma, beta


def _default_block_b(B):
    # Large tiles amortize the ~0.35 us per-grid-step overhead, but keep at
    # least 2 grid steps so dimension_semantics=("parallel",) can feed both
    # v7x TensorCores. 512 rows x (D_in + 6H) values is still far below VMEM.
    if B <= 8:
        return 8
    return min(512, _round_up(pl.cdiv(B, 2), 8))


def _resident_spec(shape):
    # Grid-invariant operand (weights / LN params): constant index_map keeps it
    # VMEM-resident across batch tiles; single-buffering avoids duplicating it
    # (matters for the 64 MiB v7x VMEM at large H, harmless at H=128).
    try:
        return pl.BlockSpec(shape, lambda i: (0, 0), pipeline_mode=pl.Buffered(1))
    except TypeError:  # older jax without the pipeline_mode kwarg
        return pl.BlockSpec(shape, lambda i: (0, 0))


def layer_norm_lstm_cell(x, h, c, wx, wh, gamma, beta, *, block_b=None):
    """One LayerNormBasicLSTMCell step.

    x: (B, D_in)   h, c: (B, H)   (any float dtype; cast internally)
    wx: (D_in, 4H) bf16   wh: (H, 4H) bf16
    gamma, beta: (5, H) f32 (rows 0-3 = f,i,o,u LN, row 4 = cell LN)
    Returns (new_h, new_c), both (B, H) f32.
    """
    B, D_in = x.shape
    H = c.shape[1]
    if block_b is None:
        block_b = _default_block_b(B)
    block_b = max(8, _round_up(block_b, 8))

    # Tail handling: pad the batch to a multiple of block_b (no assert).
    # Zero rows are harmless through LN (rsqrt(0 + eps) is finite) and are
    # sliced off below.
    B_pad = _round_up(B, block_b)
    if B_pad != B:
        pad = B_pad - B
        x = jnp.pad(x, ((0, pad), (0, 0)))
        h = jnp.pad(h, ((0, pad), (0, 0)))
        c = jnp.pad(c, ((0, pad), (0, 0)))

    # Halve the activation HBM->VMEM DMA: matmul operands enter as bf16; the
    # kernel accumulates in f32, so results match casting inside the kernel.
    x = x.astype(jnp.bfloat16)
    h = h.astype(jnp.bfloat16)
    c = c.astype(jnp.float32)

    grid = (B_pad // block_b,)
    tile = lambda shape: pl.BlockSpec(shape, lambda i: (i, 0))

    # Explicit VMEM budget (v5e's default scoped limit is only 16 MiB):
    # residents + double-buffered activation/output tiles + gate accumulator,
    # with 2x slack, clamped to [8 MiB, 64 MiB].
    vmem_need = (
        wx.nbytes + wh.nbytes + gamma.nbytes + beta.nbytes
        + 2 * block_b * (D_in + H) * 2          # x, h tiles (bf16, double buffered)
        + 2 * block_b * H * 4                   # c tile (f32, double buffered)
        + 2 * 2 * block_b * H * 4               # h_out, c_out tiles (f32)
        + block_b * 4 * H * 4                   # z gate accumulator
    )
    vmem_limit = int(min(max(2 * vmem_need, 8 << 20), 64 << 20))

    cost = pl.CostEstimate(
        flops=2 * B_pad * (D_in + H) * 4 * H,
        transcendentals=5 * B_pad * H,          # 3 sigmoid + 2 tanh per (b, h)
        bytes_accessed=(x.nbytes + h.nbytes + c.nbytes + wx.nbytes + wh.nbytes
                        + gamma.nbytes + beta.nbytes + 2 * B_pad * H * 4),
    )

    # TODO(synk): for the recurrent scan-over-T use case, fold T into the grid
    # as a trailing "arbitrary" axis (weights' index_map constant in t) and
    # alias h/c via input_output_aliases so weights stay VMEM-resident across
    # timesteps; this single-step wrapper re-DMAs them once per call.
    new_h, new_c = pl.pallas_call(
        lnlstm_kernel,
        out_shape=(jax.ShapeDtypeStruct((B_pad, H), jnp.float32),
                   jax.ShapeDtypeStruct((B_pad, H), jnp.float32)),
        grid=grid,
        in_specs=[
            tile((block_b, D_in)),          # x  (bf16)
            tile((block_b, H)),             # h  (bf16)
            tile((block_b, H)),             # c  (f32)
            _resident_spec((D_in, 4 * H)),  # Wx (bf16)
            _resident_spec((H, 4 * H)),     # Wh (bf16)
            _resident_spec((5, H)),         # packed gamma (f32)
            _resident_spec((5, H)),         # packed beta  (f32)
        ],
        out_specs=(tile((block_b, H)), tile((block_b, H))),
        compiler_params=pltpu.CompilerParams(
            dimension_semantics=("parallel",),
            vmem_limit_bytes=vmem_limit),
        cost_estimate=cost,
    )(x, h, c, wx, wh, gamma, beta)

    if B_pad != B:
        new_h = new_h[:B]
        new_c = new_c[:B]
    return new_h, new_c


def reference_matched(x, h, c, wx, wh, gamma, beta):
    """Pure-JAX reference with the same precision policy as the kernel."""
    H = c.shape[1]
    z = jnp.dot(x.astype(jnp.bfloat16), wx, preferred_element_type=jnp.float32)
    z = z + jnp.dot(h.astype(jnp.bfloat16), wh, preferred_element_type=jnp.float32)
    gates = [_layer_norm(z[:, k * H:(k + 1) * H], gamma[k], beta[k])
             for k in range(4)]
    f, i, o = (jax.nn.sigmoid(t) for t in gates[:3])
    u = jnp.tanh(gates[3])
    c_new = _layer_norm(i * u + f * c, gamma[4], beta[4])
    return o * jnp.tanh(c_new), c_new


def reference_f32(x, h, c, w_t, fiou_gamma, fiou_beta, cell_gamma, cell_beta):
    """Full-f32 reference matching the torch module exactly."""
    H = c.shape[1]
    z = jnp.concatenate([x, h], axis=1) @ w_t
    gates = [_layer_norm_two_pass(z[:, k * H:(k + 1) * H],
                                  fiou_gamma[k], fiou_beta[k])
             for k in range(4)]
    f, i, o = (jax.nn.sigmoid(t) for t in gates[:3])
    u = jnp.tanh(gates[3])
    c_new = _layer_norm_two_pass(i * u + f * c, cell_gamma[0], cell_beta[0])
    return o * jnp.tanh(c_new), c_new


if __name__ == "__main__":
    D_IN, H = 64, 128  # small, lane-aligned shapes

    key = jax.random.PRNGKey(0)
    k_w, k_g, k_b = jax.random.split(key, 3)

    # Parameters (shapes per torch module __init__):
    #   fiou_linear.weight: (4H, D_in+H), no bias -> passed transposed.
    w_t = 0.05 * jax.random.normal(k_w, (D_IN + H, 4 * H), dtype=jnp.float32)
    fiou_gamma = 1.0 + 0.1 * jax.random.normal(k_g, (4, H), dtype=jnp.float32)
    fiou_beta = 0.1 * jax.random.normal(k_b, (4, H), dtype=jnp.float32)
    cell_gamma = jnp.ones((1, H), dtype=jnp.float32)
    cell_beta = jnp.zeros((1, H), dtype=jnp.float32)

    wx, wh, gamma, beta = prepare_params(
        w_t, D_IN, fiou_gamma, fiou_beta, cell_gamma, cell_beta)

    def check(B, block_b):
        kx, kh, kc = jax.random.split(jax.random.fold_in(key, B), 3)
        x = jax.random.normal(kx, (B, D_IN), dtype=jnp.float32)
        h = jax.random.normal(kh, (B, H), dtype=jnp.float32)
        c = jax.random.normal(kc, (B, H), dtype=jnp.float32)

        new_h, new_c = layer_norm_lstm_cell(x, h, c, wx, wh, gamma, beta,
                                            block_b=block_b)
        jax.block_until_ready((new_h, new_c))
        assert new_h.shape == (B, H) and new_c.shape == (B, H)

        # Tight check vs a reference with identical precision policy.
        ref_h, ref_c = reference_matched(x, h, c, wx, wh, gamma, beta)
        assert jnp.allclose(new_h, ref_h, atol=1e-4, rtol=1e-4)
        assert jnp.allclose(new_c, ref_c, atol=1e-4, rtol=1e-4)

        # Loose sanity check vs the full-f32 torch-equivalent math
        # (bounded gap from bf16 matmul operands + one-pass LN stats).
        ref_h32, ref_c32 = reference_f32(
            x, h, c, w_t, fiou_gamma, fiou_beta, cell_gamma, cell_beta)
        assert jnp.allclose(new_h, ref_h32, atol=5e-2)
        assert jnp.allclose(new_c, ref_c32, atol=5e-2)

    check(B=16, block_b=8)      # aligned batch, 2-step (megacore-friendly) grid
    check(B=20, block_b=None)   # ragged batch -> padded tail path, default tile

    print("KERNEL_OK")
</pallas_src>

<mosaic_0001>
module attributes {stable_mosaic.version = 11 : i64} {
  func.func @lnlstm_kernel(%arg0: i32, %arg1: memref<8x64xbf16, #tpu.memory_space<vmem>>, %arg2: memref<8x128xbf16, #tpu.memory_space<vmem>>, %arg3: memref<8x128xf32, #tpu.memory_space<vmem>>, %arg4: memref<64x512xbf16, #tpu.memory_space<vmem>>, %arg5: memref<128x512xbf16, #tpu.memory_space<vmem>>, %arg6: memref<5x128xf32, #tpu.memory_space<vmem>>, %arg7: memref<5x128xf32, #tpu.memory_space<vmem>>, %arg8: memref<8x128xf32, #tpu.memory_space<vmem>>, %arg9: memref<8x128xf32, #tpu.memory_space<vmem>>) attributes {dimension_semantics = [#tpu.dimension_semantics<parallel>], iteration_bounds = array<i64: 2>, scalar_prefetch = 0 : i64, scratch_operands = 0 : i64, tpu.core_type = #tpu.core_type<tc>, window_params = [{transform_indices = @transform_0, window_bounds = array<i64: 8, 64>}, {transform_indices = @transform_1, window_bounds = array<i64: 8, 128>}, {transform_indices = @transform_2, window_bounds = array<i64: 8, 128>}, {pipeline_mode = #tpu.pipeline_mode<synchronous>, transform_indices = @transform_3, window_bounds = array<i64: 64, 512>}, {pipeline_mode = #tpu.pipeline_mode<synchronous>, transform_indices = @transform_4, window_bounds = array<i64: 128, 512>}, {pipeline_mode = #tpu.pipeline_mode<synchronous>, transform_indices = @transform_5, window_bounds = array<i64: 5, 128>}, {pipeline_mode = #tpu.pipeline_mode<synchronous>, transform_indices = @transform_6, window_bounds = array<i64: 5, 128>}, {transform_indices = @transform_7, window_bounds = array<i64: 8, 128>}, {transform_indices = @transform_8, window_bounds = array<i64: 8, 128>}]} {
    %c0 = arith.constant 0 : index
    %c0_0 = arith.constant 0 : index
    %0 = vector.load %arg1[%c0, %c0_0] : memref<8x64xbf16, #tpu.memory_space<vmem>>, vector<8x64xbf16>
    %c0_1 = arith.constant 0 : index
    %c0_2 = arith.constant 0 : index
    %1 = vector.load %arg4[%c0_1, %c0_2] : memref<64x512xbf16, #tpu.memory_space<vmem>>, vector<64x512xbf16>
    %cst = arith.constant dense<0.000000e+00> : vector<8x512xf32>
    %2 = tpu.matmul %0, %1, %cst {dimension_numbers = #tpu.dot_dimension_numbers<[1], [0], [0], [1], [0, 0, 1, 1], [], []>} : vector<8x64xbf16>, vector<64x512xbf16>, vector<8x512xf32> -> vector<8x512xf32>
    %c0_3 = arith.constant 0 : index
    %c0_4 = arith.constant 0 : index
    %3 = vector.load %arg2[%c0_3, %c0_4] : memref<8x128xbf16, #tpu.memory_space<vmem>>, vector<8x128xbf16>
    %c0_5 = arith.constant 0 : index
    %c0_6 = arith.constant 0 : index
    %4 = vector.load %arg5[%c0_5, %c0_6] : memref<128x512xbf16, #tpu.memory_space<vmem>>, vector<128x512xbf16>
    %cst_7 = arith.constant dense<0.000000e+00> : vector<8x512xf32>
    %5 = tpu.matmul %3, %4, %cst_7 {dimension_numbers = #tpu.dot_dimension_numbers<[1], [0], [0], [1], [0, 0, 1, 1], [], []>} : vector<8x128xbf16>, vector<128x512xbf16>, vector<8x512xf32> -> vector<8x512xf32>
    %6 = arith.addf %2, %5 : vector<8x512xf32>
    %7 = vector.extract_strided_slice %6 {offsets = [0, 0], sizes = [8, 128], strides = [1, 1]} : vector<8x512xf32> to vector<8x128xf32>
    %c0_8 = arith.constant 0 : index
    %c0_9 = arith.constant 0 : index
    %8 = vector.load %arg6[%c0_8, %c0_9] : memref<5x128xf32, #tpu.memory_space<vmem>>, vector<1x128xf32>
    %9 = vector.shape_cast %8 : vector<1x128xf32> to vector<128xf32>
    %c0_10 = arith.constant 0 : index
    %c0_11 = arith.constant 0 : index
    %10 = vector.load %arg7[%c0_10, %c0_11] : memref<5x128xf32, #tpu.memory_space<vmem>>, vector<1x128xf32>
    %11 = vector.shape_cast %10 : vector<1x128xf32> to vector<128xf32>
    %cst_12 = arith.constant dense<0.000000e+00> : vector<8xf32>
    %12 = vector.multi_reduction <add>, %7, %cst_12 [1] : vector<8x128xf32> to vector<8xf32>
    %13 = vector.shape_cast %12 : vector<8xf32> to vector<8x1xf32>
    %cst_13 = arith.constant 1.280000e+02 : f32
    %14 = vector.broadcast %cst_13 : f32 to vector<8x1xf32>
    %15 = arith.divf %13, %14 : vector<8x1xf32>
    %16 = arith.mulf %7, %7 : vector<8x128xf32>
    %cst_14 = arith.constant dense<0.000000e+00> : vector<8xf32>
    %17 = vector.multi_reduction <add>, %16, %cst_14 [1] : vector<8x128xf32> to vector<8xf32>
    %18 = vector.shape_cast %17 : vector<8xf32> to vector<8x1xf32>
    %cst_15 = arith.constant 1.280000e+02 : f32
    %19 = vector.broadcast %cst_15 : f32 to vector<8x1xf32>
    %20 = arith.divf %18, %19 : vector<8x1xf32>
    %21 = arith.mulf %15, %15 : vector<8x1xf32>
    %22 = arith.subf %20, %21 : vector<8x1xf32>
    %cst_16 = arith.constant 9.99999974E-6 : f32
    %23 = vector.broadcast %cst_16 : f32 to vector<8x1xf32>
    %24 = arith.addf %22, %23 : vector<8x1xf32>
    %25 = math.rsqrt %24 : vector<8x1xf32>
    %26 = vector.broadcast %15 : vector<8x1xf32> to vector<8x128xf32>
    %27 = arith.subf %7, %26 : vector<8x128xf32>
    %28 = vector.broadcast %25 : vector<8x1xf32> to vector<8x128xf32>
    %29 = arith.mulf %27, %28 : vector<8x128xf32>
    %30 = vector.shape_cast %9 : vector<128xf32> to vector<1x128xf32>
    %31 = vector.broadcast %30 : vector<1x128xf32> to vector<8x128xf32>
    %32 = arith.mulf %29, %31 : vector<8x128xf32>
    %33 = vector.shape_cast %11 : vector<128xf32> to vector<1x128xf32>
    %34 = vector.broadcast %33 : vector<1x128xf32> to vector<8x128xf32>
    %35 = arith.addf %32, %34 : vector<8x128xf32>
    %36 = vector.extract_strided_slice %6 {offsets = [0, 128], sizes = [8, 128], strides = [1, 1]} : vector<8x512xf32> to vector<8x128xf32>
    %c1 = arith.constant 1 : index
    %c0_17 = arith.constant 0 : index
    %37 = vector.load %arg6[%c1, %c0_17] : memref<5x128xf32, #tpu.memory_space<vmem>>, vector<1x128xf32>
    %38 = vector.shape_cast %37 : vector<1x128xf32> to vector<128xf32>
    %c1_18 = arith.constant 1 : index
    %c0_19 = arith.constant 0 : index
    %39 = vector.load %arg7[%c1_18, %c0_19] : memref<5x128xf32, #tpu.memory_space<vmem>>, vector<1x128xf32>
    %40 = vector.shape_cast %39 : vector<1x128xf32> to vector<128xf32>
    %cst_20 = arith.constant dense<0.000000e+00> : vector<8xf32>
    %41 = vector.multi_reduction <add>, %36, %cst_20 [1] : vector<8x128xf32> to vector<8xf32>
    %42 = vector.shape_cast %41 : vector<8xf32> to vector<8x1xf32>
    %cst_21 = arith.constant 1.280000e+02 : f32
    %43 = vector.broadcast %cst_21 : f32 to vector<8x1xf32>
    %44 = arith.divf %42, %43 : vector<8x1xf32>
    %45 = arith.mulf %36, %36 : vector<8x128xf32>
    %cst_22 = arith.constant dense<0.000000e+00> : vector<8xf32>
    %46 = vector.multi_reduction <add>, %45, %cst_22 [1] : vector<8x128xf32> to vector<8xf32>
    %47 = vector.shape_cast %46 : vector<8xf32> to vector<8x1xf32>
    %cst_23 = arith.constant 1.280000e+02 : f32
    %48 = vector.broadcast %cst_23 : f32 to vector<8x1xf32>
    %49 = arith.divf %47, %48 : vector<8x1xf32>
    %50 = arith.mulf %44, %44 : vector<8x1xf32>
    %51 = arith.subf %49, %50 : vector<8x1xf32>
    %cst_24 = arith.constant 9.99999974E-6 : f32
    %52 = vector.broadcast %cst_24 : f32 to vector<8x1xf32>
    %53 = arith.addf %51, %52 : vector<8x1xf32>
    %54 = math.rsqrt %53 : vector<8x1xf32>
    %55 = vector.broadcast %44 : vector<8x1xf32> to vector<8x128xf32>
    %56 = arith.subf %36, %55 : vector<8x128xf32>
    %57 = vector.broadcast %54 : vector<8x1xf32> to vector<8x128xf32>
    %58 = arith.mulf %56, %57 : vector<8x128xf32>
    %59 = vector.shape_cast %38 : vector<128xf32> to vector<1x128xf32>
    %60 = vector.broadcast %59 : vector<1x128xf32> to vector<8x128xf32>
    %61 = arith.mulf %58, %60 : vector<8x128xf32>
    %62 = vector.shape_cast %40 : vector<128xf32> to vector<1x128xf32>
    %63 = vector.broadcast %62 : vector<1x128xf32> to vector<8x128xf32>
    %64 = arith.addf %61, %63 : vector<8x128xf32>
    %65 = vector.extract_strided_slice %6 {offsets = [0, 256], sizes = [8, 128], strides = [1, 1]} : vector<8x512xf32> to vector<8x128xf32>
    %c2 = arith.constant 2 : index
    %c0_25 = arith.constant 0 : index
    %66 = vector.load %arg6[%c2, %c0_25] : memref<5x128xf32, #tpu.memory_space<vmem>>, vector<1x128xf32>
    %67 = vector.shape_cast %66 : vector<1x128xf32> to vector<128xf32>
    %c2_26 = arith.constant 2 : index
    %c0_27 = arith.constant 0 : index
    %68 = vector.load %arg7[%c2_26, %c0_27] : memref<5x128xf32, #tpu.memory_space<vmem>>, vector<1x128xf32>
    %69 = vector.shape_cast %68 : vector<1x128xf32> to vector<128xf32>
    %cst_28 = arith.constant dense<0.000000e+00> : vector<8xf32>
    %70 = vector.multi_reduction <add>, %65, %cst_28 [1] : vector<8x128xf32> to vector<8xf32>
    %71 = vector.shape_cast %70 : vector<8xf32> to vector<8x1xf32>
    %cst_29 = arith.constant 1.280000e+02 : f32
    %72 = vector.broadcast %cst_29 : f32 to vector<8x1xf32>
    %73 = arith.divf %71, %72 : vector<8x1xf32>
    %74 = arith.mulf %65, %65 : vector<8x128xf32>
    %cst_30 = arith.constant dense<0.000000e+00> : vector<8xf32>
    %75 = vector.multi_reduction <add>, %74, %cst_30 [1] : vector<8x128xf32> to vector<8xf32>
    %76 = vector.shape_cast %75 : vector<8xf32> to vector<8x1xf32>
    %cst_31 = arith.constant 1.280000e+02 : f32
    %77 = vector.broadcast %cst_31 : f32 to vector<8x1xf32>
    %78 = arith.divf %76, %77 : vector<8x1xf32>
    %79 = arith.mulf %73, %73 : vector<8x1xf32>
    %80 = arith.subf %78, %79 : vector<8x1xf32>
    %cst_32 = arith.constant 9.99999974E-6 : f32
    %81 = vector.broadcast %cst_32 : f32 to vector<8x1xf32>
    %82 = arith.addf %80, %81 : vector<8x1xf32>
    %83 = math.rsqrt %82 : vector<8x1xf32>
    %84 = vector.broadcast %73 : vector<8x1xf32> to vector<8x128xf32>
    %85 = arith.subf %65, %84 : vector<8x128xf32>
    %86 = vector.broadcast %83 : vector<8x1xf32> to vector<8x128xf32>
    %87 = arith.mulf %85, %86 : vector<8x128xf32>
    %88 = vector.shape_cast %67 : vector<128xf32> to vector<1x128xf32>
    %89 = vector.broadcast %88 : vector<1x128xf32> to vector<8x128xf32>
    %90 = arith.mulf %87, %89 : vector<8x128xf32>
    %91 = vector.shape_cast %69 : vector<128xf32> to vector<1x128xf32>
    %92 = vector.broadcast %91 : vector<1x128xf32> to vector<8x128xf32>
    %93 = arith.addf %90, %92 : vector<8x128xf32>
    %94 = vector.extract_strided_slice %6 {offsets = [0, 384], sizes = [8, 128], strides = [1, 1]} : vector<8x512xf32> to vector<8x128xf32>
    %c3 = arith.constant 3 : index
    %c0_33 = arith.constant 0 : index
    %95 = vector.load %arg6[%c3, %c0_33] : memref<5x128xf32, #tpu.memory_space<vmem>>, vector<1x128xf32>
    %96 = vector.shape_cast %95 : vector<1x128xf32> to vector<128xf32>
    %c3_34 = arith.constant 3 : index
    %c0_35 = arith.constant 0 : index
    %97 = vector.load %arg7[%c3_34, %c0_35] : memref<5x128xf32, #tpu.memory_space<vmem>>, vector<1x128xf32>
    %98 = vector.shape_cast %97 : vector<1x128xf32> to vector<128xf32>
    %cst_36 = arith.constant dense<0.000000e+00> : vector<8xf32>
    %99 = vector.multi_reduction <add>, %94, %cst_36 [1] : vector<8x128xf32> to vector<8xf32>
    %100 = vector.shape_cast %99 : vector<8xf32> to vector<8x1xf32>
    %cst_37 = arith.constant 1.280000e+02 : f32
    %101 = vector.broadcast %cst_37 : f32 to vector<8x1xf32>
    %102 = arith.divf %100, %101 : vector<8x1xf32>
    %103 = arith.mulf %94, %94 : vector<8x128xf32>
    %cst_38 = arith.constant dense<0.000000e+00> : vector<8xf32>
    %104 = vector.multi_reduction <add>, %103, %cst_38 [1] : vector<8x128xf32> to vector<8xf32>
    %105 = vector.shape_cast %104 : vector<8xf32> to vector<8x1xf32>
    %cst_39 = arith.constant 1.280000e+02 : f32
    %106 = vector.broadcast %cst_39 : f32 to vector<8x1xf32>
    %107 = arith.divf %105, %106 : vector<8x1xf32>
    %108 = arith.mulf %102, %102 : vector<8x1xf32>
    %109 = arith.subf %107, %108 : vector<8x1xf32>
    %cst_40 = arith.constant 9.99999974E-6 : f32
    %110 = vector.broadcast %cst_40 : f32 to vector<8x1xf32>
    %111 = arith.addf %109, %110 : vector<8x1xf32>
    %112 = math.rsqrt %111 : vector<8x1xf32>
    %113 = vector.broadcast %102 : vector<8x1xf32> to vector<8x128xf32>
    %114 = arith.subf %94, %113 : vector<8x128xf32>
    %115 = vector.broadcast %112 : vector<8x1xf32> to vector<8x128xf32>
    %116 = arith.mulf %114, %115 : vector<8x128xf32>
    %117 = vector.shape_cast %96 : vector<128xf32> to vector<1x128xf32>
    %118 = vector.broadcast %117 : vector<1x128xf32> to vector<8x128xf32>
    %119 = arith.mulf %116, %118 : vector<8x128xf32>
    %120 = vector.shape_cast %98 : vector<128xf32> to vector<1x128xf32>
    %121 = vector.broadcast %120 : vector<1x128xf32> to vector<8x128xf32>
    %122 = arith.addf %119, %121 : vector<8x128xf32>
    %123 = arith.negf %35 : vector<8x128xf32>
    %124 = math.exp %123 : vector<8x128xf32>
    %cst_41 = arith.constant 1.000000e+00 : f32
    %125 = vector.broadcast %cst_41 : f32 to vector<8x128xf32>
    %126 = arith.addf %125, %124 : vector<8x128xf32>
    %127 = arith.divf %125, %126 : vector<8x128xf32>
    %128 = arith.negf %64 : vector<8x128xf32>
    %129 = math.exp %128 : vector<8x128xf32>
    %cst_42 = arith.constant 1.000000e+00 : f32
    %130 = vector.broadcast %cst_42 : f32 to vector<8x128xf32>
    %131 = arith.addf %130, %129 : vector<8x128xf32>
    %132 = arith.divf %130, %131 : vector<8x128xf32>
    %133 = arith.negf %93 : vector<8x128xf32>
    %134 = math.exp %133 : vector<8x128xf32>
    %cst_43 = arith.constant 1.000000e+00 : f32
    %135 = vector.broadcast %cst_43 : f32 to vector<8x128xf32>
    %136 = arith.addf %135, %134 : vector<8x128xf32>
    %137 = arith.divf %135, %136 : vector<8x128xf32>
    %138 = math.tanh %122 : vector<8x128xf32>
    %139 = arith.mulf %132, %138 : vector<8x128xf32>
    %c0_44 = arith.constant 0 : index
    %c0_45 = arith.constant 0 : index
    %140 = vector.load %arg3[%c0_44, %c0_45] : memref<8x128xf32, #tpu.memory_space<vmem>>, vector<8x128xf32>
    %141 = arith.mulf %127, %140 : vector<8x128xf32>
    %142 = arith.addf %139, %141 : vector<8x128xf32>
    %c4 = arith.constant 4 : index
    %c0_46 = arith.constant 0 : index
    %143 = vector.load %arg6[%c4, %c0_46] : memref<5x128xf32, #tpu.memory_space<vmem>>, vector<1x128xf32>
    %144 = vector.shape_cast %143 : vector<1x128xf32> to vector<128xf32>
    %c4_47 = arith.constant 4 : index
    %c0_48 = arith.constant 0 : index
    %145 = vector.load %arg7[%c4_47, %c0_48] : memref<5x128xf32, #tpu.memory_space<vmem>>, vector<1x128xf32>
    %146 = vector.shape_cast %145 : vector<1x128xf32> to vector<128xf32>
    %cst_49 = arith.constant dense<0.000000e+00> : vector<8xf32>
    %147 = vector.multi_reduction <add>, %142, %cst_49 [1] : vector<8x128xf32> to vector<8xf32>
    %148 = vector.shape_cast %147 : vector<8xf32> to vector<8x1xf32>
    %cst_50 = arith.constant 1.280000e+02 : f32
    %149 = vector.broadcast %cst_50 : f32 to vector<8x1xf32>
    %150 = arith.divf %148, %149 : vector<8x1xf32>
    %151 = arith.mulf %142, %142 : vector<8x128xf32>
    %cst_51 = arith.constant dense<0.000000e+00> : vector<8xf32>
    %152 = vector.multi_reduction <add>, %151, %cst_51 [1] : vector<8x128xf32> to vector<8xf32>
    %153 = vector.shape_cast %152 : vector<8xf32> to vector<8x1xf32>
    %cst_52 = arith.constant 1.280000e+02 : f32
    %154 = vector.broadcast %cst_52 : f32 to vector<8x1xf32>
    %155 = arith.divf %153, %154 : vector<8x1xf32>
    %156 = arith.mulf %150, %150 : vector<8x1xf32>
    %157 = arith.subf %155, %156 : vector<8x1xf32>
    %cst_53 = arith.constant 9.99999974E-6 : f32
    %158 = vector.broadcast %cst_53 : f32 to vector<8x1xf32>
    %159 = arith.addf %157, %158 : vector<8x1xf32>
    %160 = math.rsqrt %159 : vector<8x1xf32>
    %161 = vector.broadcast %150 : vector<8x1xf32> to vector<8x128xf32>
    %162 = arith.subf %142, %161 : vector<8x128xf32>
    %163 = vector.broadcast %160 : vector<8x1xf32> to vector<8x128xf32>
    %164 = arith.mulf %162, %163 : vector<8x128xf32>
    %165 = vector.shape_cast %144 : vector<128xf32> to vector<1x128xf32>
    %166 = vector.broadcast %165 : vector<1x128xf32> to vector<8x128xf32>
    %167 = arith.mulf %164, %166 : vector<8x128xf32>
    %168 = vector.shape_cast %146 : vector<128xf32> to vector<1x128xf32>
    %169 = vector.broadcast %168 : vector<1x128xf32> to vector<8x128xf32>
    %170 = arith.addf %167, %169 : vector<8x128xf32>
    %c0_54 = arith.constant 0 : index
    %c0_55 = arith.constant 0 : index
    %171 = vector.load %arg9[%c0_54, %c0_55] : memref<8x128xf32, #tpu.memory_space<vmem>>, vector<8x128xf32>
    tpu.vector_store %arg9[%c0_54, %c0_55], %170 {strides = array<i32>} : memref<8x128xf32, #tpu.memory_space<vmem>>, vector<8x128xf32>,
    %172 = math.tanh %170 : vector<8x128xf32>
    %173 = arith.mulf %137, %172 : vector<8x128xf32>
    %c0_56 = arith.constant 0 : index
    %c0_57 = arith.constant 0 : index
    %174 = vector.load %arg8[%c0_56, %c0_57] : memref<8x128xf32, #tpu.memory_space<vmem>>, vector<8x128xf32>
    tpu.vector_store %arg8[%c0_56, %c0_57], %173 {strides = array<i32>} : memref<8x128xf32, #tpu.memory_space<vmem>>, vector<8x128xf32>,
    return
  }
  func.func @transform_0(%arg0: i32) -> (i32, i32) {
    %c0_i32 = arith.constant 0 : i32
    %c0_i32_0 = arith.constant 0 : i32
    return %arg0, %c0_i32 : i32, i32
  }
  func.func @transform_1(%arg0: i32) -> (i32, i32) {
    %c0_i32 = arith.constant 0 : i32
    %c0_i32_0 = arith.constant 0 : i32
    return %arg0, %c0_i32 : i32, i32
  }
  func.func @transform_2(%arg0: i32) -> (i32, i32) {
    %c0_i32 = arith.constant 0 : i32
    %c0_i32_0 = arith.constant 0 : i32
    return %arg0, %c0_i32 : i32, i32
  }
  func.func @transform_3(%arg0: i32) -> (i32, i32) {
    %c0_i32 = arith.constant 0 : i32
    %c0_i32_0 = arith.constant 0 : i32
    %c0_i32_1 = arith.constant 0 : i32
    return %c0_i32, %c0_i32_0 : i32, i32
  }
  func.func @transform_4(%arg0: i32) -> (i32, i32) {
    %c0_i32 = arith.constant 0 : i32
    %c0_i32_0 = arith.constant 0 : i32
    %c0_i32_1 = arith.constant 0 : i32
    return %c0_i32, %c0_i32_0 : i32, i32
  }
  func.func @transform_5(%arg0: i32) -> (i32, i32) {
    %c0_i32 = arith.constant 0 : i32
    %c0_i32_0 = arith.constant 0 : i32
    %c0_i32_1 = arith.constant 0 : i32
    return %c0_i32, %c0_i32_0 : i32, i32
  }
  func.func @transform_6(%arg0: i32) -> (i32, i32) {
    %c0_i32 = arith.constant 0 : i32
    %c0_i32_0 = arith.constant 0 : i32
    %c0_i32_1 = arith.constant 0 : i32
    return %c0_i32, %c0_i32_0 : i32, i32
  }
  func.func @transform_7(%arg0: i32) -> (i32, i32) {
    %c0_i32 = arith.constant 0 : i32
    %c0_i32_0 = arith.constant 0 : i32
    return %arg0, %c0_i32 : i32, i32
  }
  func.func @transform_8(%arg0: i32) -> (i32, i32) {
    %c0_i32 = arith.constant 0 : i32
    %c0_i32_0 = arith.constant 0 : i32
    return %arg0, %c0_i32 : i32, i32
  }
}

</mosaic_0001>

<bundles_post_ra>
// kernel: tpu_custom_call.1
= control target key start
LH: loop header
LB: loop body
LE: loop exit
PB: predicated region body
PF: predicated region fallthrough
CT: control target
= control target key end

     0   :  { %s2227_s0 = inlined_call_operand.hbm [shape: bf16[16,64], index: 0, kind: input, shape index: {}]   ;;  %s2228_s1 = inlined_call_operand.hbm [shape: bf16[16,128], index: 1, kind: input, shape index: {}]   ;;  %s2229_s2 = inlined_call_operand.hbm [shape: f32[16,128], index: 2, kind: input, shape index: {}]   ;;  %s2230_s3 = inlined_call_operand.hbm [shape: bf16[64,512], index: 3, kind: input, shape index: {}]   ;;  %s2231_s4 = inlined_call_operand.hbm [shape: bf16[128,512], index: 4, kind: input, shape index: {}]   ;;  %s2232_s5 = inlined_call_operand.vmem [shape: f32[5,128], index: 5, kind: input, shape index: {}]   ;;  %s2233_s6 = inlined_call_operand.vmem [shape: f32[5,128], index: 6, kind: input, shape index: {}]   ;;  %s2234_s7 = inlined_call_operand.hbm [shape: f32[16,128], index: 7, kind: output, shape index: {0}]   ;;  %s2235_s8 = inlined_call_operand.hbm [shape: f32[16,128], index: 8, kind: output, shape index: {1}]  }
   0x1   :  { %2255 = sst [smem:[#allocation23_spill]] %s2228_s1 }
   0x2   :  { %2256 = sst [smem:[#allocation24_spill]] %s2230_s3 }
   0x3   :  { %14 = vsyncpa [#allocation3], 0 }
   0x4   :  { %16 = vsyncpa [#allocation3 + $0x1], 0 }
   0x5   :  { %17 = vsyncpa [#allocation6], 0 }
   0x6   :  { %19 = vsyncpa [#allocation6 + $0x1], 0 }
   0x7   :  { %20 = vsyncpa [#allocation9], 0 }
   0x8   :  { %21 = vsyncpa [#allocation4], 0 }
   0x9   :  { %23 = vsyncpa [#allocation4 + $0x1], 0 }
   0xa   :  { %24 = vsyncpa [#allocation13], 0 }
   0xb   :  { %26 = vsyncpa [#allocation13 + $0x1], 0  ;;  %s1828_s27 = smov 0   ;;  %s1830_s28 = smov 0  }
   0xc   :  { %s1832_s29 = smov 0   ;;  %s1834_s30 = smov 0  }
   0xd LB: > { %2257 = sst [smem:[#allocation19_spill]] %s1767_s29  ;;  %s1849_s9 = sadd.s32 4294967295, %s1771_s30   ;;  %s1771_s30 = sphi %s1834_s30, %s2289_s30   ;;  %s1767_s29 = sphi %s1832_s29, %s2291_s29   ;;  %s1763_s28 = sphi %s1830_s28, %s2293_s28   ;;  %s1759_s27 = sphi %s1828_s27, %s2292_s27  }
   0xe   : > { %s1240_s10 = sadd.s32 4294967294, %s1771_s30   ;;  %p52_p0 = scmp.ne.s32.totalorder %s1763_s28, %s1759_s27 }
   0xf   : > { %p2236_p1 = scmp.eq.s32.totalorder %s1849_s9, 0  ;;  %p218_p3 = scmp.eq.s32.totalorder %s1240_s10, 1 }
  0x10   : > { %p1241_p5 = scmp.ge.s32.totalorder %s1771_s30, 1  ;;  %p251_p7 = scmp.lt.s32.totalorder %s1771_s30, 3 }
  0x11   : > { %p1858_p4 = por %p2236_p1, %p52_p0  ;;  %p1863_p6 = por %p218_p3, %p52_p0 }
  0x12   : > { %p1868_p8 = pnand %p1241_p5, %p251_p7  ;;  %s1773_s14 = smov [#allocation8]  }
  0x13   : > { %s2258_s11 = scalar_select %p1858_p4, 1, 0 }
  0x14   : > { %s2259_s12 = scalar_select %p1863_p6, 1, 0 }
  0x15   : > { %s2261_s13 = scalar_select %p1868_p8, 1, 0 }
  0x16   : > { %2260 = sst [smem:[#allocation20_spill]] %s2259_s12  ;;  %s263_s15 = sshll.u32 %s1773_s14, 4  ;;  %s1872_s15 = int_to_ptr.vmem [resolvable:$true] %s263_s15 }
  0x17   : > { %p1354_p9 = pneg %p1868_p8  ;;  %s1884_s17 = sadd.s32 1, %s1771_s30  }
  0x18   : > { %2263 = sst [smem:[#allocation21_spill]] %s1884_s17  ;;  %s39_s18 = sadd.s32 1, %s1767_s29 }
  0x19   : > { %p1879_p11 = pnand %p1354_p9, %p2236_p1  ;;  %s36_s19 = ssub.s32 %s1771_s30, %s1884_s17 }
  0x1a   : > { %s2264_s3 = sld [smem:[#allocation24_spill]] }
  0x1b   : > { %s2262_s16 = scalar_select %p1879_p11, 1, 0 }
  0x1c   : > { %p2242_p13 = pneg %p1879_p11 }
  0x20   : > { %s1519_s22 = scalar_lea.hbm %s2264_s3, 2048 }
  0x21   : > { %p1520_p12 = scmp.ne.s32.totalorder %s2264_s3, %s1519_s22  ;;  %p1526_p5 = scmp.lt.u32.totalorder %s1519_s22, %s2264_s3 }
  0x23   : > { %p1522_p0 = pnand %p2242_p13, %p1520_p12 }
  0x25   : > { %p1523_p3 = pneg %p1522_p0 }
  0x27   : > { %p1528_p7 = pnand %p1526_p5, %p1523_p3 }
  0x29   : > { %1531 = shalt.err (!%p1528_p7)
}
  0x2a   : > { %s1532_s10 = scalar_lea.vmem %s1872_s15, 2048  ;;  %p1540_p2 = scmp.lt.s32.totalorder %s1872_s15, %s1872_s15 }
  0x2b   : > { %p1533_p9 = scmp.ne.s32.totalorder %s1872_s15, %s1532_s10  ;;  %p1541_p12 = scmp.lt.s32.totalorder %s1532_s10, %s1532_s10 }
  0x2d   : > { %p1535_p10 = pnand %p1533_p9, %p2242_p13  ;;  %p1542_p0 = por %p1541_p12, %p1540_p2 }
  0x2f   : > { %p1536_p1 = pneg %p1535_p10 }
  0x31   : > { %p1543_p6 = pnand %p1542_p0, %p1536_p1 }
  0x33   : > { %1546 = shalt.err (!%p1543_p6)
}
  0x34   : > { %s2237_s14 = smov 256   ;;  %s2238_s20 = smov 16  }
  0x35   : > { %1357 = dma.hbm_to_vmem [thread:$0]  (!%p1879_p11), %s2264_s3, 2048, %s1872_s15, [#allocation9], %s2237_s14, %s2237_s14, %s2238_s20  }
  0x36   : > { %p37_p1 = scmp.eq.s32.totalorder %s36_s19, 0  ;;  %p46_p2 = scmp.ne.s32.totalorder %s1767_s29, %s1763_s28 }
  0x37   : > { %p47_p6 = scmp.eq.s32.totalorder %s1771_s30, 0  ;;  %p1380_p10 = scmp.lt.s32.totalorder %s1771_s30, 2 }
  0x38   : > { %s1924_s23 = scalar_select %p37_p1, %s1767_s29, %s39_s18  }
  0x39   : > { %p48_p3 = por %p47_p6, %p46_p2  ;;  %p2266_p5 = scmp.eq.s32.totalorder %s1849_s9, 1 }
  0x3a   : > { %2265 = sst [smem:[#allocation22_spill]] %s1924_s23  ;;  %s1933_s25 = sand.u32 1, %s1767_s29  }
  0x3b   : > { %p1928_p7 = por %p2266_p5, %p46_p2  ;;  %s2241_s26 = sshll.u32 %s1771_s30, 6 }
  0x3c   : > { %s2240_s10 = sshll.u32 %s1933_s25, 2  ;;  %p1937_p9 = pnand %p1380_p10, %p48_p3 }
  0x3d   : > { %s2267_s24 = scalar_select %p1928_p7, 1, 0 }
  0x3e   : > { %s2268_s15 = scalar_select %p1937_p9, 1, 0 }
  0x3f   : > { %s314_s19 = sand.u32 1, %s1771_s30   ;;  %s2269_s1 = sld [smem:[#allocation23_spill]] }
  0x40   : > { %s318_s14 = scalar_lea.vmem [#allocation5], %s2240_s10  ;;  %s1953_s3 = scalar_lea.sflag [#allocation6], %s314_s19 }
  0x41   : > { %s325_s20 = sshll.u32 %s318_s14, 4  ;;  %p1959_p0 = pneg %p1937_p9  ;;  %s1951_s20 = int_to_ptr.vmem [resolvable:$true] %s325_s20 }
  0x43   : > { %s2270_s29 = scalar_select %p1959_p0, 1, 0 }
  0x45   : > { %s1947_s22 = scalar_lea.hbm %s2269_s1, %s2241_s26  ;;  %s1552_s10 = scalar_lea.hbm %s2269_s1, 128 }
  0x46   : > { %s1547_s23 = scalar_lea.hbm %s1947_s22, 64  ;;  %p1553_p6 = scmp.lt.u32.totalorder %s1947_s22, %s2269_s1 }
  0x47   : > { %p1548_p12 = scmp.ne.s32.totalorder %s1947_s22, %s1547_s23  ;;  %p1554_p10 = scmp.lt.u32.totalorder %s1552_s10, %s1547_s23 }
  0x48   : > { %p1556_p5 = scmp.lt.u32.totalorder %s1547_s23, %s1947_s22 }
  0x49   : > { %p1550_p1 = pnand %p1959_p0, %p1548_p12  ;;  %p1555_p3 = por %p1554_p10, %p1553_p6 }
  0x4b   : > { %p1551_p2 = pneg %p1550_p1  ;;  %p1557_p13 = por %p1556_p5, %p1555_p3 }
  0x4d   : > { %p1558_p7 = pnand %p1557_p13, %p1551_p2 }
  0x4f   : > { %1561 = shalt.err (!%p1558_p7)
}
  0x50   : > { %s1562_s19 = scalar_lea.vmem %s1951_s20, 64  ;;  %s1776_s18 = smov [#allocation5]  }
  0x51   : > { %p1563_p12 = scmp.ne.s32.totalorder %s1951_s20, %s1562_s19  ;;  %s1567_s21 = sshll.u32 %s1776_s18, 4  ;;  %s1568_s21 = int_to_ptr.vmem [resolvable:$false] %s1567_s21 }
  0x52   : > { %s1569_s26 = scalar_lea.vmem %s1568_s21, 128  ;;  %p1570_p8 = scmp.lt.s32.totalorder %s1951_s20, %s1568_s21 }
  0x53   : > { %p1565_p1 = pnand %p1563_p12, %p1959_p0  ;;  %p1571_p11 = scmp.lt.s32.totalorder %s1569_s26, %s1562_s19 }
  0x55   : > { %p1566_p4 = pneg %p1565_p1  ;;  %p1572_p6 = por %p1571_p11, %p1570_p8 }
  0x57   : > { %p1573_p10 = pnand %p1572_p6, %p1566_p4 }
  0x59   : > { %1576 = shalt.err (!%p1573_p10)
}
  0x5a   : > { %1367 = dma.hbm_to_vmem [thread:$0]  (!%p1937_p9), %s1947_s22, 64, %s1951_s20, %s1953_s3  }
  0x5b   : > { %s1777_s23 = smov [#allocation10]   ;;  %s1577_s18 = scalar_lea.hbm %s2231_s4, 4096 }
  0x5c   : > { %s276_s10 = sshll.u32 %s1777_s23, 4  ;;  %p1578_p8 = scmp.ne.s32.totalorder %s2231_s4, %s1577_s18  ;;  %s277_s10 = int_to_ptr.vmem [resolvable:$true] %s276_s10 }
  0x5d   : > { %p2271_p4 = scmp.ne.s32.totalorder %s2262_s16, 0  ;;  %p1584_p2 = scmp.lt.u32.totalorder %s1577_s18, %s2231_s4 }
  0x5f   : > { %p2272_p11 = pneg %p2271_p4 }
  0x61   : > { %p1580_p13 = pnand %p1578_p8, %p2272_p11 }
  0x63   : > { %p1581_p7 = pneg %p1580_p13 }
  0x65   : > { %p1586_p3 = pnand %p1584_p2, %p1581_p7 }
  0x67   : > { %1589 = shalt.err (!%p1586_p3)
}
  0x68   : > { %s1590_s20 = scalar_lea.vmem %s277_s10, 4096  ;;  %p2273_p12 = pmov %p2272_p11 }
  0x69   : > { %p1591_p5 = scmp.ne.s32.totalorder %s277_s10, %s1590_s20  ;;  %p1598_p10 = scmp.lt.s32.totalorder %s277_s10, %s277_s10 }
  0x6a   : > { %p1599_p9 = scmp.lt.s32.totalorder %s1590_s20, %s1590_s20 }
  0x6b   : > { %p1593_p1 = pnand %p1591_p5, %p2273_p12 }
  0x6c   : > { %p1600_p0 = por %p1599_p9, %p1598_p10 }
  0x6d   : > { %p1594_p6 = pneg %p1593_p1 }
  0x6f   : > { %p1601_p8 = pnand %p1600_p0, %p1594_p6 }
  0x71   : > { %1604 = shalt.err (!%p1601_p8)
}
  0x72   : > { %s2274_s1 = smov 16   ;;  %s2275_s17 = smov 256  }
  0x73   : > { %1360 = dma.hbm_to_vmem [thread:$0]  (!%p2271_p4), %s2231_s4, 4096, %s277_s10, [#allocation9], %s2275_s17, %s2275_s17, %s2274_s1  }
  0x74   : > { %s2276_s14 = sshll.u32 %s1771_s30, 6  ;;  %s2277_s26 = sshll.u32 %s1933_s25, 2 }
  0x75   : > { %s2011_s19 = scalar_lea.hbm %s2227_s0, %s2276_s14  ;;  %s300_s16 = scalar_lea.vmem [#allocation2], %s2277_s26 }
  0x76   : > { %s307_s20 = sshll.u32 %s300_s16, 4  ;;  %s1249_s22 = sshll.u32 %s1933_s25, 3  ;;  %s2015_s20 = int_to_ptr.vmem [resolvable:$true] %s307_s20 }
  0x77   : > { %s297_s23 = scalar_lea.sflag [#allocation3], %s1933_s25  ;;  %s1605_s12 = scalar_lea.hbm %s2011_s19, 64 }
  0x78   : > { %p1606_p9 = scmp.ne.s32.totalorder %s2011_s19, %s1605_s12  ;;  %p2278_p0 = scmp.ne.s32.totalorder %s2270_s29, 0 }
  0x79   : > { %s1610_s17 = scalar_lea.hbm %s2227_s0, 128  ;;  %p1611_p13 = scmp.lt.u32.totalorder %s2011_s19, %s2227_s0 }
  0x7a   : > { %p1608_p4 = pnand %p1606_p9, %p2278_p0  ;;  %p1612_p7 = scmp.lt.u32.totalorder %s1610_s17, %s1605_s12 }
  0x7b   : > { %p1614_p3 = scmp.lt.u32.totalorder %s1605_s12, %s2011_s19 }
  0x7c   : > { %p1609_p11 = pneg %p1608_p4  ;;  %p1613_p2 = por %p1612_p7, %p1611_p13 }
  0x7e   : > { %p1615_p5 = por %p1614_p3, %p1613_p2 }
  0x80   : > { %p1616_p12 = pnand %p1615_p5, %p1609_p11 }
  0x82   : > { %1619 = shalt.err (!%p1616_p12)
}
  0x83   : > { %s1620_s21 = scalar_lea.vmem %s2015_s20, 64  ;;  %s1778_s26 = smov [#allocation2]  }
  0x84   : > { %p1621_p1 = scmp.ne.s32.totalorder %s2015_s20, %s1620_s21  ;;  %s1625_s16 = sshll.u32 %s1778_s26, 4  ;;  %s1626_s16 = int_to_ptr.vmem [resolvable:$false] %s1625_s16 }
  0x85   : > { %s1627_s10 = scalar_lea.vmem %s1626_s16, 128  ;;  %p1628_p8 = scmp.lt.s32.totalorder %s2015_s20, %s1626_s16 }
  0x86   : > { %p1623_p6 = pnand %p1621_p1, %p2278_p0  ;;  %p1629_p9 = scmp.lt.s32.totalorder %s1627_s10, %s1620_s21 }
  0x88   : > { %p1624_p10 = pneg %p1623_p6  ;;  %p1630_p4 = por %p1629_p9, %p1628_p8 }
  0x8a   : > { %p1631_p13 = pnand %p1630_p4, %p1624_p10 }
  0x8c   : > { %1634 = shalt.err (!%p1631_p13)
}
  0x8d   : > { %p2279_p11 = scmp.ne.s32.totalorder %s2268_s15, 0  ;;  %s1250_s12 = sshll.u32 %s1771_s30, 7 }
  0x8e   : > { %s2044_s14 = scalar_lea.hbm %s2229_s2, %s1250_s12  ;;  %s336_s18 = scalar_lea.vmem [#allocation7], %s1249_s22 }
  0x8f   : > { %1364 = dma.hbm_to_vmem [thread:$0]  (!%p2279_p11), %s2011_s19, 64, %s2015_s20, %s297_s23  }
  0x90   : > { %s343_s21 = sshll.u32 %s336_s18, 4  ;;  %s1635_s26 = scalar_lea.hbm %s2044_s14, 128  ;;  %s344_s21 = int_to_ptr.vmem [resolvable:$true] %s343_s21 }
  0x91   : > { %p1636_p7 = scmp.ne.s32.totalorder %s2044_s14, %s1635_s26  ;;  %s1640_s23 = scalar_lea.hbm %s2229_s2, 256 }
  0x92   : > { %p1641_p5 = scmp.lt.u32.totalorder %s2044_s14, %s2229_s2  ;;  %p1642_p12 = scmp.lt.u32.totalorder %s1640_s23, %s1635_s26 }
  0x93   : > { %p1638_p2 = pnand %p1636_p7, %p2278_p0  ;;  %p1644_p6 = scmp.lt.u32.totalorder %s1635_s26, %s2044_s14 }
  0x94   : > { %p1643_p1 = por %p1642_p12, %p1641_p5 }
  0x95   : > { %p1639_p3 = pneg %p1638_p2 }
  0x96   : > { %p1645_p10 = por %p1644_p6, %p1643_p1 }
  0x98   : > { %p1646_p8 = pnand %p1645_p10, %p1639_p3 }
  0x9a   : > { %1649 = shalt.err (!%p1646_p8)
}
  0x9b   : > { %s1650_s25 = scalar_lea.vmem %s344_s21, 128  ;;  %s1779_s22 = smov [#allocation7]  }
  0x9c   : > { %p1651_p9 = scmp.ne.s32.totalorder %s344_s21, %s1650_s25  ;;  %s1655_s12 = sshll.u32 %s1779_s22, 4  ;;  %s1656_s12 = int_to_ptr.vmem [resolvable:$false] %s1655_s12 }
  0x9d   : > { %s1657_s1 = scalar_lea.vmem %s1656_s12, 256  ;;  %p1658_p7 = scmp.lt.s32.totalorder %s344_s21, %s1656_s12 }
  0x9e   : > { %p1653_p4 = pnand %p1651_p9, %p2278_p0  ;;  %p1659_p2 = scmp.lt.s32.totalorder %s1657_s1, %s1650_s25 }
  0xa0   : > { %p1654_p13 = pneg %p1653_p4  ;;  %p1660_p11 = por %p1659_p2, %p1658_p7 }
  0xa2   : > { %p1661_p5 = pnand %p1660_p11, %p1654_p13 }
  0xa4   : > { %1664 = shalt.err (!%p1661_p5)
}
  0xa5   : > { %p2280_p12 = scmp.ne.s32.totalorder %s2268_s15, 0  ;;  %p2281_p3 = scmp.ne.s32.totalorder %s2261_s13, 0 }
  0xa6   : > { %s2069_s29 = sand.u32 (!%p2281_p3), 1, %s1763_s28   ;;  %p2282_p0 = scmp.ne.s32.totalorder (!%p2281_p3), %s2258_s11, 0 }
  0xa7   : > { %1370 = dma.hbm_to_vmem [thread:$0]  (!%p2280_p12), %s2044_s14, 128, %s344_s21, %s1953_s3  }
  0xa8   : > { %352 = sbr.rel (%p2281_p3) target bundleno = 850 (0x352), region = 48  ;;  %s1252_s17 = sshll.u32 (!%p2281_p3), %s2069_s29, 2 }
  0xa9   : > { %s355_s18 = scalar_lea.sflag (!%p2281_p3), [#allocation3], %s2069_s29  ;;  %s2073_s26 = scalar_lea.vmem (!%p2281_p3), [#allocation2], %s1252_s17 }
  0xaf   : > { %1738 = dma.done.wait (%p2282_p0), %s355_s18, 64  }
  0xb0   : > { %1740 = vsyncadd (%p2282_p0), %s355_s18, 4294967232  ;;  %s363_s3 = sand.u32 1, %s1849_s9   ;;  %s2080_s15 = scalar_lea.vmem [#allocation5], %s1252_s17 }
  0xb1   : > { %s364_s13 = scalar_lea.sflag [#allocation6], %s363_s3 }
  0xb2   : > { %1742 = dma.done.wait (%p2282_p0), %s364_s13, 192  }
  0xb3   : > { %1744 = vsyncadd (%p2282_p0), %s364_s13, 4294967104  ;;  %s2087_s14 = sshll.u32 %s2069_s29, 3  ;;  %p2283_p11 = scmp.eq.s32.totalorder %s1849_s9, 0 }
  0xb4   : > { %s376_s21 = scalar_lea.vmem [#allocation7], %s2087_s14 }
  0xb5   : > { %1746 = dma.done.wait (%p2283_p11), [#allocation9], 6144   ;;  %p2284_p1 = pmov %p2283_p11 }
  0xb6   : > { %v1780_v0 = vmov 0   ;;  %v1421_v1 = vld [vmem:[#allocation10 + $0x4] ss:$16 sps:$4 sm:$0xff]   ;;  %v1423_v2 = vld [vmem:[#allocation10 + $0xc] ss:$16 sps:$4 sm:$0xff]   ;;  %vm805_vm0 = vcmask 523264  }
  0xb7   : > { %1748 = vsyncadd (%p2284_p1), [#allocation9], 4294961152  ;;  %675 = vmatprep.mubr.bf16.mxu0 %v1780_v0  ;;  %716 = vmatprep.mubr.bf16.mxu1 %v1780_v0  ;;  %v1425_v3 = vld [vmem:[#allocation10] ss:$16 sps:$4 sm:$0xff]   ;;  %v1426_v4 = vld [vmem:[#allocation10 + $0x8] ss:$16 sps:$4 sm:$0xff]  }
  0xb8   : > { %643 = vmatprep.subr.bf16.mxu0 %v1421_v1  ;;  %684 = vmatprep.subr.bf16.mxu1 %v1423_v2  ;;  %v1427_v5 = vld [vmem:[#allocation10 + $0x24] ss:$16 sps:$4 sm:$0xff]   ;;  %v1429_v6 = vld [vmem:[#allocation10 + $0x2c] ss:$16 sps:$4 sm:$0xff]   ;;  %v1431_v7 = vld [vmem:[#allocation10 + $0x20] ss:$16 sps:$4 sm:$0xff]  }
  0xb9   : > { %644 = vmatpush1.bf16.msra.mxu0 %v1425_v3  ;;  %685 = vmatpush1.bf16.msra.mxu1 %v1426_v4  ;;  %v1432_v8 = vld [vmem:[#allocation10 + $0x28] ss:$16 sps:$4 sm:$0xff]   ;;  %v1433_v9 = vld [vmem:[#allocation10 + $0x44] ss:$16 sps:$4 sm:$0xff]   ;;  %v1435_v10 = vld [vmem:[#allocation10 + $0x4c] ss:$16 sps:$4 sm:$0xff]  }
  0xba   : > { %645 = vmatprep.subr.bf16.mxu0 %v1427_v5  ;;  %686 = vmatprep.subr.bf16.mxu1 %v1429_v6  ;;  %v1437_v11 = vld [vmem:[#allocation10 + $0x40] ss:$16 sps:$4 sm:$0xff]   ;;  %v1438_v12 = vld [vmem:[#allocation10 + $0x48] ss:$16 sps:$4 sm:$0xff]   ;;  %v1439_v13 = vld [vmem:[#allocation10 + $0x64] ss:$16 sps:$4 sm:$0xff]  }
  0xbb   : > { %v1441_v14 = vld [vmem:[#allocation10 + $0x6c] ss:$16 sps:$4 sm:$0xff]   ;;  %v1443_v15 = vld [vmem:[#allocation10 + $0x60] ss:$16 sps:$4 sm:$0xff]   ;;  %v1444_v16 = vld [vmem:[#allocation10 + $0x68] ss:$16 sps:$4 sm:$0xff]  }
  0xbc   : > { %v1445_v17 = vld [vmem:[#allocation10 + $0x84] ss:$16 sps:$4 sm:$0xff]   ;;  %v1447_v18 = vld [vmem:[#allocation10 + $0x8c] ss:$16 sps:$4 sm:$0xff]   ;;  %v1449_v19 = vld [vmem:[#allocation10 + $0x80] ss:$16 sps:$4 sm:$0xff]  }
  0xbd   : > { %646 = vmatpush1.bf16.msra.mxu0 %v1431_v7  ;;  %687 = vmatpush1.bf16.msra.mxu1 %v1432_v8  ;;  %v1450_v20 = vld [vmem:[#allocation10 + $0x88] ss:$16 sps:$4 sm:$0xff]   ;;  %v1451_v21 = vld [vmem:[#allocation10 + $0xa4] ss:$16 sps:$4 sm:$0xff]   ;;  %v1453_v22 = vld [vmem:[#allocation10 + $0xac] ss:$16 sps:$4 sm:$0xff]  }
  0xbe   : > { %647 = vmatprep.subr.bf16.mxu0 %v1433_v9  ;;  %688 = vmatprep.subr.bf16.mxu1 %v1435_v10  ;;  %v1455_v23 = vld [vmem:[#allocation10 + $0xa0] ss:$16 sps:$4 sm:$0xff]   ;;  %v1456_v24 = vld [vmem:[#allocation10 + $0xa8] ss:$16 sps:$4 sm:$0xff]   ;;  %v1457_v25 = vld [vmem:[#allocation10 + $0xc4] ss:$16 sps:$4 sm:$0xff]  }
  0xbf   : > { %v1459_v26 = vld [vmem:[#allocation10 + $0xcc] ss:$16 sps:$4 sm:$0xff]   ;;  %v1461_v27 = vld [vmem:[#allocation10 + $0xc0] ss:$16 sps:$4 sm:$0xff]   ;;  %v1462_v28 = vld [vmem:[#allocation10 + $0xc8] ss:$16 sps:$4 sm:$0xff]  }
  0xc0   : > { %v1463_v29 = vld [vmem:[#allocation10 + $0xe4] ss:$16 sps:$4 sm:$0xff]   ;;  %v1465_v30 = vld [vmem:[#allocation10 + $0xec] ss:$16 sps:$4 sm:$0xff]   ;;  %v1467_v31 = vld [vmem:[#allocation10 + $0xe0] ss:$16 sps:$4 sm:$0xff]  }
  0xc1   : > { %648 = vmatpush1.bf16.msra.mxu0 %v1437_v11  ;;  %689 = vmatpush1.bf16.msra.mxu1 %v1438_v12  ;;  %v1468_v32 = vld [vmem:[#allocation10 + $0xe8] ss:$16 sps:$4 sm:$0xff]   ;;  %v1471_v33 = vld [vmem:[#allocation8 + $0x4] ss:$16 sps:$4 sm:$0xff]   ;;  %v1474_v34 = vld [vmem:[#allocation8 + $0xc] ss:$16 sps:$4 sm:$0xff]  }
  0xc2   : > { %649 = vmatprep.subr.bf16.mxu0 %v1439_v13  ;;  %690 = vmatprep.subr.bf16.mxu1 %v1441_v14  ;;  %v1469_v35 = vld [vmem:[#allocation8] ss:$16 sps:$4 sm:$0xff]   ;;  %v1472_v36 = vld [vmem:[#allocation8 + $0x8] ss:$16 sps:$4 sm:$0xff]   ;;  %v1477_v38 = vld [vmem:[#allocation8 + $0x24] ss:$16 sps:$4 sm:$0xff]  }
  0xc3   : > { %v450_v37 = vld [vmem:[%s2080_s15] sm:$0xf]  ;;  %v1475_v40 = vld [vmem:[#allocation8 + $0x20] ss:$16 sps:$4 sm:$0xff]   ;;  %v1483_v42 = vld [vmem:[#allocation8 + $0x44] ss:$16 sps:$4 sm:$0xff]  }
  0xc4   : > { %v1480_v39 = vld [vmem:[#allocation8 + $0x2c] ss:$16 sps:$4 sm:$0xff]   ;;  %v1478_v41 = vld [vmem:[#allocation8 + $0x28] ss:$16 sps:$4 sm:$0xff]   ;;  %v1481_v44 = vld [vmem:[#allocation8 + $0x40] ss:$16 sps:$4 sm:$0xff]  }
  0xc5   : > { %650 = vmatpush1.bf16.msra.mxu0 %v1443_v15  ;;  %691 = vmatpush1.bf16.msra.mxu1 %v1444_v16  ;;  %v1486_v43 = vld [vmem:[#allocation8 + $0x4c] ss:$16 sps:$4 sm:$0xff]   ;;  %v1484_v45 = vld [vmem:[#allocation8 + $0x48] ss:$16 sps:$4 sm:$0xff]   ;;  %v1489_v46 = vld [vmem:[#allocation8 + $0x64] ss:$16 sps:$4 sm:$0xff]  }
  0xc6   : > { %651 = vmatprep.subr.bf16.mxu0 %v1445_v17  ;;  %692 = vmatprep.subr.bf16.mxu1 %v1447_v18  ;;  %v1492_v47 = vld [vmem:[#allocation8 + $0x6c] ss:$16 sps:$4 sm:$0xff]   ;;  %v1487_v48 = vld [vmem:[#allocation8 + $0x60] ss:$16 sps:$4 sm:$0xff]   ;;  %v1490_v49 = vld [vmem:[#allocation8 + $0x68] ss:$16 sps:$4 sm:$0xff]  }
  0xc7   : > { %v433_v50 = vld [vmem:[%s2073_s26] sm:$0xf]  ;;  %s1324_s23 = sshll.u32 %s1849_s9, 7  ;;  %s431_s16 = scalar_lea.vmem [#allocation12], %s2087_s14 }
  0xc8   : > { %s1076_s10 = sshll.u32 %s431_s16, 4  ;;  %s2151_s12 = scalar_lea.hbm %s2235_s8, %s1324_s23  ;;  %s2153_s10 = int_to_ptr.vmem [resolvable:$true] %s1076_s10 }
  0xc9   : > { %652 = vmatpush1.bf16.msra.mxu0 %v1449_v19  ;;  %693 = vmatpush1.bf16.msra.mxu1 %v1450_v20  ;;  %s1050_s1 = scalar_lea.sflag [#allocation13], %s2069_s29  ;;  %s1665_s17 = scalar_lea.vmem %s2153_s10, 128 }
  0xca   : > { %653 = vmatprep.subr.bf16.mxu0 %v1451_v21  ;;  %694 = vmatprep.subr.bf16.mxu1 %v1453_v22  ;;  %v1309_v22 = vld [vmem:[%s2232_s5] ss:$0 sm:$0xff]  ;;  %p1666_p6 = scmp.ne.s32.totalorder %s2153_s10, %s1665_s17  ;;  %p2285_p10 = scmp.ne.s32.totalorder %s2267_s24, 0 }
  0xcb   : > { %s1781_s18 = smov [#allocation12]  }
  0xcc   : > { %p1667_p8 = pnand %p1666_p6, %p2285_p10  ;;  %s1669_s26 = sshll.u32 %s1781_s18, 4  ;;  %s1670_s26 = int_to_ptr.vmem [resolvable:$false] %s1669_s26 }
  0xcd   : > { %654 = vmatpush1.bf16.msra.mxu0 %v1455_v23  ;;  %695 = vmatpush1.bf16.msra.mxu1 %v1456_v24  ;;  %v1310_v24 = vld [vmem:[%s2233_s6] ss:$0 sm:$0xff]  ;;  %s1671_s3 = scalar_lea.vmem %s1670_s26, 256  ;;  %p1672_p4 = scmp.lt.s32.totalorder %s2153_s10, %s1670_s26 }
  0xce   : > { %655 = vmatprep.subr.bf16.mxu0 %v1457_v25  ;;  %696 = vmatprep.subr.bf16.mxu1 %v1459_v26  ;;  %p1668_p9 = pneg %p1667_p8  ;;  %p1673_p13 = scmp.lt.s32.totalorder %s1671_s3, %s1665_s17 }
  0xd0   : > { %p1674_p7 = por %p1673_p13, %p1672_p4 }
  0xd1   : > { %656 = vmatpush1.bf16.msra.mxu0 %v1461_v27  ;;  %697 = vmatpush1.bf16.msra.mxu1 %v1462_v28  ;;  %v1311_v28 = vld [vmem:[%s2232_s5 + $0x1] ss:$0 sm:$0xff] }
  0xd2   : > { %657 = vmatprep.subr.bf16.mxu0 %v1463_v29  ;;  %698 = vmatprep.subr.bf16.mxu1 %v1465_v30  ;;  %p1675_p2 = pnand %p1674_p7, %p1668_p9 }
  0xd5   : > { %658 = vmatpush1.bf16.msra.mxu0 %v1467_v31  ;;  %699 = vmatpush1.bf16.msra.mxu1 %v1468_v32  ;;  %v1312_v31 = vld [vmem:[%s2233_s6 + $0x1] ss:$0 sm:$0xff] }
  0xd6   : > { %809 = vmatprep.subr.bf16.mxu0 %v1471_v33  ;;  %850 = vmatprep.subr.bf16.mxu1 %v1474_v34 }
  0xd8   : > { %676 = vmatmul.mubr.bf16.vlgmr.msra.gmra.mrb[0].mxu0 %v450_v37  ;;  %717 = vmatmul.mubr.bf16.vlgmr.msra.gmra.mrb[0].mxu1 %v450_v37 }
  0xd9   : > { %810 = vmatpush1.bf16.msra.mxu0 %v1469_v35  ;;  %851 = vmatpush1.bf16.msra.mxu1 %v1472_v36 }
  0xda   : > { %811 = vmatprep.subr.bf16.mxu0 %v1477_v38  ;;  %852 = vmatprep.subr.bf16.mxu1 %v1480_v39  ;;  %v1315_v39 = vld [vmem:[%s2232_s5 + $0x3] ss:$0 sm:$0xff] }
  0xdb   : > { %841 = vmatprep.mubr.bf16.mxu0 %v1780_v0  ;;  %882 = vmatprep.mubr.bf16.mxu1 %v1780_v0 }
  0xdd   : > { %812 = vmatpush1.bf16.msra.mxu0 %v1475_v40  ;;  %853 = vmatpush1.bf16.msra.mxu1 %v1478_v41  ;;  %v1316_v41 = vld [vmem:[%s2233_s6 + $0x3] ss:$0 sm:$0xff] }
  0xde   : > { %813 = vmatprep.subr.bf16.mxu0 %v1483_v42  ;;  %854 = vmatprep.subr.bf16.mxu1 %v1486_v43 }
  0xe1   : > { %814 = vmatpush1.bf16.msra.mxu0 %v1481_v44  ;;  %855 = vmatpush1.bf16.msra.mxu1 %v1484_v45 }
  0xe2   : > { %815 = vmatprep.subr.bf16.mxu0 %v1489_v46  ;;  %856 = vmatprep.subr.bf16.mxu1 %v1492_v47 }
  0xe5   : > { %816 = vmatpush1.bf16.msra.mxu0 %v1487_v48  ;;  %857 = vmatpush1.bf16.msra.mxu1 %v1490_v49  ;;  %v1012_v48 = vld [vmem:[%s376_s21] sm:$0xff] }
  0xe8   : > { %1307 = vmatmul.mubr.msk.bf16.vlgmr.msra.gmra.mrb[0].mxu0 %vm805_vm0, %v433_v50  ;;  %1308 = vmatmul.mubr.msk.bf16.vlgmr.msra.gmra.mrb[0].mxu1 %vm805_vm0, %v433_v50 }
 0x1bb   : > { %v843_v51 = vpop.f32.mrb[0].mxu0  ;;  %v2100_v52 = vpop.f32.mrb[0].mxu1 }
 0x1bc   : > { %v2102_v53 = vpop.f32.mrb[1].mxu1  ;;  %893 = vadd.xlane.f32.xlu0 %v843_v51  ;;  %v845_v54 = vpop.f32.mrb[1].mxu0  ;;  %v897_v55 = vmul.f32 %v843_v51, %v843_v51  ;;  %v947_v62 = vmul.f32 %v2100_v52, %v2100_v52 }
 0x1bd   : > { %v847_v56 = vpop.f32.mrb[2].mxu0  ;;  %v888_v57 = vpop.f32.mrb[2].mxu1  ;;  %v922_v60 = vmul.f32 %v845_v54, %v845_v54  ;;  %v972_v61 = vmul.f32 %v2102_v53, %v2102_v53 }
 0x1be   : > { %v889_v58 = vpop.f32.mrb[3].mxu1  ;;  %898 = vadd.xlane.f32.xlu1 %v897_v55  ;;  %v848_v59 = vpop.f32.mrb[3].mxu0 }
 0x1c0   : > { %919 = vadd.xlane.f32.xlu0 %v845_v54 }
 0x1c2   : > { %923 = vadd.xlane.f32.xlu1 %v922_v60 }
 0x1c4   : > { %969 = vadd.xlane.f32.xlu0 %v2102_v53 }
 0x1c6   : > { %973 = vadd.xlane.f32.xlu1 %v972_v61 }
 0x1c8   : > { %944 = vadd.xlane.f32.xlu0 %v2100_v52 }
 0x1ca   : > { %948 = vadd.xlane.f32.xlu1 %v947_v62 }
 0x249   : > { %v894_v63 = vpop.xlane.xlu0 %893 }
 0x24a   : > { %v896_v0 = vmul.f32 0.0078125, %v894_v63 }
 0x24b   : > { %v899_v1 = vpop.xlane.xlu1 %898 }
 0x24c   : > { %v901_v2 = vmul.f32 %v896_v0, %v896_v0  ;;  %v900_v3 = vmul.f32 0.0078125, %v899_v1  ;;  %v905_v20 = vsub.f32 %v843_v51, %v896_v0 }
 0x24d   : > { %v920_v4 = vpop.xlane.xlu0 %919 }
 0x24e   : > { %v902_v5 = vsub.f32 %v900_v3, %v901_v2  ;;  %v921_v6 = vmul.f32 0.0078125, %v920_v4  ;;  %v1313_v2 = vld [vmem:[%s2232_s5 + $0x2] ss:$0 sm:$0xff] }
 0x24f   : > { %v924_v7 = vpop.xlane.xlu1 %923  ;;  %v1314_v4 = vld [vmem:[%s2233_s6 + $0x2] ss:$0 sm:$0xff] }
 0x250   : > { %v903_v8 = vadd.f32 1e-05, %v902_v5  ;;  %v926_v9 = vmul.f32 %v921_v6, %v921_v6  ;;  %v925_v10 = vmul.f32 0.0078125, %v924_v7  ;;  %v930_v26 = vsub.f32 %v845_v54, %v921_v6 }
 0x251   : > { %v970_v11 = vpop.xlane.xlu0 %969 }
 0x252   : > { %1493 = vrsqrt.f32 %v903_v8  ;;  %v927_v12 = vsub.f32 %v925_v10, %v926_v9  ;;  %v971_v13 = vmul.f32 0.0078125, %v970_v11 }
 0x253   : > { %v974_v14 = vpop.xlane.xlu1 %973 }
 0x254   : > { %v928_v15 = vadd.f32 1e-05, %v927_v12  ;;  %v976_v16 = vmul.f32 %v971_v13, %v971_v13  ;;  %v975_v17 = vmul.f32 0.0078125, %v974_v14  ;;  %v980_v37 = vsub.f32 %v2102_v53, %v971_v13 }
 0x255   : > { %v945_v56 = vpop.xlane.xlu0 %944 }
 0x256   : > { %1495 = vrsqrt.f32 %v928_v15  ;;  %v977_v18 = vsub.f32 %v975_v17, %v976_v16  ;;  %v946_v57 = vmul.f32 0.0078125, %v945_v56  ;;  %v1320_v16 = vld [vmem:[%s2232_s5 + $0x4] ss:$0 sm:$0xff] }
 0x257   : > { %v949_v58 = vpop.xlane.xlu1 %948 }
 0x258   : > { %v978_v19 = vadd.f32 1e-05, %v977_v18  ;;  %v951_v59 = vmul.f32 %v946_v57, %v946_v57  ;;  %v950_v60 = vmul.f32 0.0078125, %v949_v58  ;;  %v955_v0 = vsub.f32 %v2100_v52, %v946_v57  ;;  %v1321_v18 = vld [vmem:[%s2233_s6 + $0x4] ss:$0 sm:$0xff] }
 0x25a   : > { %1497 = vrsqrt.f32 %v978_v19  ;;  %v952_v61 = vsub.f32 %v950_v60, %v951_v59 }
 0x25c   : > { %v1494_v21 = vpop.eup %1493  ;;  %v953_v62 = vadd.f32 1e-05, %v952_v61 }
 0x25d   : > { %v906_v23 = vmul.f32 %v1494_v21, %v905_v20 }
 0x25f   : > { %v911_v25 = vmul.f32 %v1309_v22, %v906_v23 }
 0x260   : > { %v1496_v27 = vpop.eup %1495 }
 0x261   : > { %v916_v29 = vadd.f32 %v1310_v24, %v911_v25  ;;  %v931_v30 = vmul.f32 %v1496_v27, %v930_v26 }
 0x263   : > { %v1317_v32 = vmul.f32 -1.442695, %v916_v29  ;;  %v936_v33 = vmul.f32 %v1311_v28, %v931_v30 }
 0x264   : > { %v1498_v35 = vpop.eup %1497 }
 0x265   : > { %1499 = vpow2.f32 %v1317_v32  ;;  %v941_v34 = vadd.f32 %v1312_v31, %v936_v33  ;;  %v981_v38 = vmul.f32 %v1498_v35, %v980_v37 }
 0x267   : > { %v1318_v36 = vmul.f32 -1.442695, %v941_v34  ;;  %v986_v40 = vmul.f32 %v1315_v39, %v981_v38 }
 0x269   : > { %1501 = vpow2.f32 %v1318_v36  ;;  %v991_v44 = vadd.f32 %v1316_v41, %v986_v40 }
 0x26f   : > { %v1500_v42 = vpop.eup %1499 }
 0x270   : > { %v995_v43 = vadd.f32 1.0, %v1500_v42 }
 0x272   : > { %1503 = vrcp.f32 %v995_v43 }
 0x273   : > { %v1502_v45 = vpop.eup %1501  ;;  %1505 = vtanh.f32 %v991_v44 }
 0x274   : > { %v1001_v46 = vadd.f32 1.0, %v1502_v45 }
 0x276   : > { %1507 = vrcp.f32 %v1001_v46 }
 0x277   : > { %1509 = vrsqrt.f32 %v953_v62 }
 0x27c   : > { %v1504_v47 = vpop.eup %1503 }
 0x27d   : > { %v1506_v49 = vpop.eup %1505  ;;  %v1013_v53 = vmul.f32 %v1504_v47, %v1012_v48 }
 0x280   : > { %v1508_v50 = vpop.eup %1507 }
 0x281   : > { %v1011_v51 = vmul.f32 %v1508_v50, %v1506_v49  ;;  %v1510_v63 = vpop.eup %1509 }
 0x282   : > { %v956_v1 = vmul.f32 %v1510_v63, %v955_v0 }
 0x283   : > { %v1014_v54 = vadd.f32 %v1013_v53, %v1011_v51 }
 0x284   : > { %v961_v3 = vmul.f32 %v1313_v2, %v956_v1 }
 0x285   : > { %1017 = vadd.xlane.f32.xlu0 %v1014_v54  ;;  %v1020_v55 = vmul.f32 %v1014_v54, %v1014_v54 }
 0x286   : > { %v966_v5 = vadd.f32 %v1314_v4, %v961_v3 }
 0x287   : > { %1021 = vadd.xlane.f32.xlu1 %v1020_v55 }
 0x288   : > { %v1319_v11 = vmul.f32 -1.442695, %v966_v5 }
 0x28a   : > { %1511 = vpow2.f32 %v1319_v11 }
 0x294   : > { %v1512_v13 = vpop.eup %1511 }
 0x295   : > { %v1007_v19 = vadd.f32 1.0, %v1512_v13 }
 0x312   : > { %v1018_v6 = vpop.xlane.xlu0 %1017 }
 0x313   : > { %v1019_v7 = vmul.f32 0.0078125, %v1018_v6 }
 0x314   : > { %v1022_v8 = vpop.xlane.xlu1 %1021 }
 0x315   : > { %v1024_v9 = vmul.f32 %v1019_v7, %v1019_v7  ;;  %v1023_v10 = vmul.f32 0.0078125, %v1022_v8  ;;  %v1028_v14 = vsub.f32 %v1014_v54, %v1019_v7 }
 0x317   : > { %v1025_v52 = vsub.f32 %v1023_v10, %v1024_v9 }
 0x319   : > { %v1026_v12 = vadd.f32 1e-05, %v1025_v52 }
 0x31b   : > { %1513 = vrsqrt.f32 %v1026_v12 }
 0x31c   : > { %1515 = vrcp.f32 %v1007_v19 }
 0x325   : > { %v1514_v15 = vpop.eup %1513 }
 0x326   : > { %v1029_v17 = vmul.f32 %v1514_v15, %v1028_v14 }
 0x328   : > { %v1034_v20 = vmul.f32 %v1320_v16, %v1029_v17 }
 0x32a   : > { %v1039_v21 = vadd.f32 %v1321_v18, %v1034_v20 }
 0x32c   : > { %1517 = vtanh.f32 %v1039_v21  ;;  %1040 = vst [vmem:[%s431_s16] sm:$0xff] %v1039_v21 }
 0x32d   : > { %1678 = shalt.err (!%p1675_p2)
}
 0x32e   : > { %s1679_s13 = scalar_lea.hbm %s2151_s12, 128  ;;  %s1683_s11 = scalar_lea.hbm %s2235_s8, 256 }
 0x32f   : > { %p1680_p5 = scmp.ne.s32.totalorder %s2151_s12, %s1679_s13  ;;  %p1684_p0 = scmp.lt.u32.totalorder %s2151_s12, %s2235_s8 }
 0x330   : > { %p1685_p11 = scmp.lt.u32.totalorder %s1683_s11, %s1679_s13  ;;  %p1687_p6 = scmp.lt.u32.totalorder %s1679_s13, %s2151_s12 }
 0x331   : > { %p1681_p12 = pnand %p1680_p5, %p2285_p10 }
 0x332   : > { %p1686_p1 = por %p1685_p11, %p1684_p0 }
 0x333   : > { %p1682_p3 = pneg %p1681_p12 }
 0x334   : > { %p1688_p8 = por %p1687_p6, %p1686_p1 }
 0x336   : > { %p1689_p9 = pnand %p1688_p8, %p1682_p3 }
 0x338   : > { %1692 = shalt.err (!%p1689_p9)
}
 0x339   : > { %1351 = dma.vmem_to_hbm [thread:$0]  (%p2285_p10), %s2153_s10, 128, %s2151_s12, %s1050_s1   ;;  %v1516_v22 = vpop.eup %1515 }
 0x33a   : > { %s424_s16 = scalar_lea.vmem [#allocation11], %s2087_s14  ;;  %v1518_v23 = vpop.eup %1517  ;;  %s2183_s18 = scalar_lea.hbm %s2234_s7, %s1324_s23 }
 0x33b   : > { %s1063_s25 = sshll.u32 %s424_s16, 4  ;;  %v1042_v24 = vmul.f32 %v1518_v23, %v1516_v22  ;;  %s1045_s26 = scalar_lea.sflag [#allocation4], %s2069_s29  ;;  %s2185_s25 = int_to_ptr.vmem [resolvable:$true] %s1063_s25 }
 0x33c   : > { %s1693_s3 = scalar_lea.vmem %s2185_s25, 128  ;;  %s1782_s14 = smov [#allocation11]  }
 0x33d   : > { %1043 = vst [vmem:[%s424_s16] sm:$0xff] %v1042_v24  ;;  %p1694_p4 = scmp.ne.s32.totalorder %s2185_s25, %s1693_s3  ;;  %s1697_s10 = sshll.u32 %s1782_s14, 4  ;;  %s1698_s10 = int_to_ptr.vmem [resolvable:$false] %s1697_s10 }
 0x33e   : > { %s1699_s9 = scalar_lea.vmem %s1698_s10, 256  ;;  %p1700_p2 = scmp.lt.s32.totalorder %s2185_s25, %s1698_s10 }
 0x33f   : > { %p1695_p13 = pnand %p1694_p4, %p2285_p10  ;;  %p1701_p5 = scmp.lt.s32.totalorder %s1699_s9, %s1693_s3 }
 0x341   : > { %p1696_p7 = pneg %p1695_p13  ;;  %p1702_p12 = por %p1701_p5, %p1700_p2 }
 0x343   : > { %p1703_p3 = pnand %p1702_p12, %p1696_p7 }
 0x345   : > { %1706 = shalt.err (!%p1703_p3)
}
 0x346   : > { %s1707_s29 = scalar_lea.hbm %s2183_s18, 128  ;;  %s1711_s1 = scalar_lea.hbm %s2234_s7, 256 }
 0x347   : > { %p1708_p0 = scmp.ne.s32.totalorder %s2183_s18, %s1707_s29  ;;  %p1712_p6 = scmp.lt.u32.totalorder %s2183_s18, %s2234_s7 }
 0x348   : > { %p1713_p8 = scmp.lt.u32.totalorder %s1711_s1, %s1707_s29  ;;  %p1715_p4 = scmp.lt.u32.totalorder %s1707_s29, %s2183_s18 }
 0x349   : > { %p1709_p11 = pnand %p1708_p0, %p2285_p10 }
 0x34a   : > { %p1714_p9 = por %p1713_p8, %p1712_p6 }
 0x34b   : > { %p1710_p1 = pneg %p1709_p11 }
 0x34c   : > { %p1716_p13 = por %p1715_p4, %p1714_p9 }
 0x34e   : > { %p1717_p7 = pnand %p1716_p13, %p1710_p1 }
 0x350   : > { %1720 = shalt.err (!%p1717_p7)
}
 0x351   : > { %1350 = dma.vmem_to_hbm [thread:$0]  (%p2285_p10), %s2185_s25, 128, %s2183_s18, %s1045_s26  }
 0x352 PF: > { %s2286_s21 = sld [smem:[#allocation20_spill]]  ;;  %s1088_s11 = sand.u32 1, %s1759_s27  }
 0x353   : > { %p2288_p5 = scmp.ge.s32.totalorder %s1771_s30, 2  ;;  %s1089_s19 = scalar_lea.sflag [#allocation4], %s1088_s11 }
 0x358   : > { %p2287_p2 = scmp.ne.s32.totalorder %s2286_s21, 0 }
 0x35a   : > { %p1372_p12 = pnand %p2288_p5, %p2287_p2 }
 0x35c   : > { %1750 = dma.done.wait (!%p1372_p12), %s1089_s19, 128  }
 0x35d   : > { %1752 = vsyncadd (!%p1372_p12), %s1089_s19, 4294967168  ;;  %s1098_s20 = scalar_lea.sflag [#allocation13], %s1088_s11 }
 0x35e   : > { %1754 = dma.done.wait (!%p1372_p12), %s1098_s20, 128  }
 0x35f   : > { %1756 = vsyncadd (!%p1372_p12), %s1098_s20, 4294967168  ;;  %s2289_s30 = sld [smem:[#allocation21_spill]]  ;;  %s2290_s24 = sld [smem:[#allocation19_spill]] }
 0x360   : > { %s2291_s29 = sld [smem:[#allocation22_spill]]  ;;  %s2292_s27 = smov %s1763_s28 }
 0x365   : > { %p29_p10 = scmp.ge.s32.totalorder %s2289_s30, 4   ;;  %s2293_s28 = smov %s2290_s24 }
 0x367   :  { %31 = sbr.rel (!%p29_p10) target bundleno = 13 (0xd), region = 142 }
 0x36e   :  { %1103 = vsyncpa [#allocation3], 1 }
 0x36f   :  { %1105 = vsyncpa [#allocation3 + $0x1], 1 }
 0x370   :  { %1106 = vsyncpa [#allocation6], 1 }
 0x371   :  { %1108 = vsyncpa [#allocation6 + $0x1], 1 }
 0x372   :  { %1109 = vsyncpa [#allocation9], 1 }
 0x373   :  { %1110 = vsyncpa [#allocation4], 1 }
 0x374   :  { %1112 = vsyncpa [#allocation4 + $0x1], 1 }
 0x375   :  { %1113 = vsyncpa [#allocation13], 1 }
 0x376   :  { %1115 = vsyncpa [#allocation13 + $0x1], 1 }

</bundles_post_ra>
